<compile_context>
chip_gen: v6e
topology: v6e:2x2x1
jax: 0.10.0
libtpu: 0.0.40
codegen_flags: <defaults>
</compile_context>

<pallas_src>
import functools

import jax
import jax.numpy as jnp
from jax.experimental import pallas as pl
from jax.experimental.pallas import tpu as pltpu

_LANE = 128
_SUBLANE = 8
_MAX_TR = 16384       # guards the (TR, 128) f32 chunk-accumulator temp (<=8 MiB)
_FULL_UNROLL = 16     # <= this many 128-lane chunks -> fully unrolled adds


def _round_up(x, m):
    return (x + m - 1) // m * m


def _round_down_to(x, m):
    return max(m, x // m * m)


@functools.lru_cache(maxsize=None)
def _vmem_budget():
    """(input-block bytes, scoped vmem_limit_bytes) sized per TPU generation."""
    try:
        cap = int(pltpu.get_tpu_info().vmem_capacity_bytes)
    except Exception:
        cap = 0
    if cap >= 96 * 1024 * 1024:
        # v5e / v6e class (128 MiB VMEM): big in-flight DMAs to hit roofline.
        return 16 * 1024 * 1024, 80 * 1024 * 1024
    # v7x class (64 MiB VMEM) or unknown: leave headroom for the 2x
    # double-buffered input blocks plus in-kernel f32 chunk accumulators.
    return 6 * 1024 * 1024, 40 * 1024 * 1024


def _sum_chunks_from_ref(x_ref, n_chunks):
    """f32 (TR, 128) partial sums of the first n_chunks*128 lanes of x_ref.

    Loads one 128-lane chunk at a time directly from the ref so live ranges
    stay bounded (no whole-tile load / full-width f32 temporary).
    """
    first = x_ref[:, pl.ds(0, _LANE)].astype(jnp.float32)
    if n_chunks == 1:
        return first
    if n_chunks <= _FULL_UNROLL:
        acc = first
        for j in range(1, n_chunks):
            acc = acc + x_ref[:, pl.ds(j * _LANE, _LANE)].astype(jnp.float32)
        return acc

    def body(j, acc):
        start = pl.multiple_of(j * _LANE, _LANE)
        return acc + x_ref[:, pl.ds(start, _LANE)].astype(jnp.float32)

    return jax.lax.fori_loop(1, n_chunks, body, first, unroll=8)


def _accum_chunks_into(acc_ref, x_ref, n_chunks):
    """acc_ref[...] (f32 (TR,128)) += per-lane sums of first n_chunks chunks."""
    if n_chunks == 0:
        return
    if n_chunks <= _FULL_UNROLL:
        acc = acc_ref[...]
        for j in range(n_chunks):
            acc = acc + x_ref[:, pl.ds(j * _LANE, _LANE)].astype(jnp.float32)
        acc_ref[...] = acc
        return

    def body(j, acc):
        start = pl.multiple_of(j * _LANE, _LANE)
        return acc + x_ref[:, pl.ds(start, _LANE)].astype(jnp.float32)

    acc_ref[...] = jax.lax.fori_loop(0, n_chunks, body, acc_ref[...], unroll=8)


def _gap_rows_kernel(x_ref, o_ref, *, inv_s, s):
    """Single-axis grid: each block holds TR rows x the full spatial extent."""
    n_full = s // _LANE
    rem = s % _LANE
    total = None
    if n_full > 0:
        acc = _sum_chunks_from_ref(x_ref, n_full)        # per-chunk VPU adds
        total = jnp.sum(acc, axis=-1, keepdims=True)     # one cross-lane reduce
    if rem > 0:
        tail = x_ref[:, pl.ds(n_full * _LANE, rem)].astype(jnp.float32)
        tail_sum = jnp.sum(tail, axis=-1, keepdims=True)
        total = tail_sum if total is None else total + tail_sum
    o_ref[...] = (total * inv_s).astype(o_ref.dtype)


def _gap_acc_kernel(x_ref, o_ref, acc_ref, *, inv_s, ts, valid_last):
    """Two-axis grid (rows parallel, spatial arbitrary) with f32 accumulator."""
    k = pl.program_id(1)
    last = pl.num_programs(1) - 1
    n_full = ts // _LANE                  # ts is a multiple of 128
    n_full_last = valid_last // _LANE     # valid prefix of the last S tile
    rem_last = valid_last % _LANE

    @pl.when(k == 0)
    def _init():
        acc_ref[...] = jnp.zeros_like(acc_ref)

    def _finalize():
        total = jnp.sum(acc_ref[...], axis=-1, keepdims=True)
        if rem_last > 0:
            tail = x_ref[:, pl.ds(n_full_last * _LANE, rem_last)]
            total = total + jnp.sum(tail.astype(jnp.float32), axis=-1,
                                    keepdims=True)
        o_ref[...] = (total * inv_s).astype(o_ref.dtype)

    if valid_last == ts:
        # Every spatial tile is fully in-bounds: uniform accumulation.
        _accum_chunks_into(acc_ref, x_ref, n_full)

        @pl.when(k == last)
        def _():
            _finalize()
    else:
        @pl.when(k != last)
        def _():
            _accum_chunks_into(acc_ref, x_ref, n_full)

        @pl.when(k == last)
        def _():
            # Only the statically known valid prefix of the last spatial tile
            # is read, so no per-step iota/compare masking is needed anywhere.
            _accum_chunks_into(acc_ref, x_ref, n_full_last)
            _finalize()


def gap(x, *, block_bytes=None, vmem_limit_bytes=None):
    """Adaptive average pool to (1, 1): (N, C, H, W) -> (N, C, 1, 1)."""
    N, C, H, W = x.shape
    R, S = N * C, H * W
    itemsize = jnp.dtype(x.dtype).itemsize
    # Sublane packing: 8 rows for 32-bit, 16 for 16-bit, 32 for 8-bit dtypes.
    row_align = _SUBLANE * max(1, 4 // itemsize)
    inv_s = 1.0 / S
    s_padded = _round_up(S, _LANE)    # lane padding the DMA / VMEM actually sees

    default_block, default_limit = _vmem_budget()
    block_bytes = default_block if block_bytes is None else block_bytes
    vmem_limit_bytes = (default_limit if vmem_limit_bytes is None
                        else vmem_limit_bytes)

    x2 = x.reshape(R, S)  # free contiguous view of NCHW
    out_shape = jax.ShapeDtypeStruct((R, 1), x.dtype)
    cost = pl.CostEstimate(flops=R * S, transcendentals=0,
                           bytes_accessed=R * S * itemsize + R * itemsize)

    r_cap = _round_up(R, row_align)
    # Keep >= 2 row tiles when R allows so both v7x TensorCores get work on the
    # "parallel" row axis; the extra ~0.35us grid step is noise elsewhere.
    r_half_cap = max(row_align, _round_up(pl.cdiv(R, 2), row_align))

    rows_that_fit = block_bytes // max(1, s_padded * itemsize)

    if rows_that_fit >= row_align:
        # ---- Path A: row-tiled grid, full spatial extent per block. ----
        tr = _round_down_to(min(rows_that_fit, _MAX_TR, r_cap, r_half_cap),
                            row_align)
        num_r = pl.cdiv(R, tr)
        tr = min(tr, _round_up(pl.cdiv(R, num_r), row_align))   # balance tiles
        num_r = pl.cdiv(R, tr)
        out = pl.pallas_call(
            functools.partial(_gap_rows_kernel, inv_s=inv_s, s=S),
            out_shape=out_shape,
            grid=(num_r,),
            in_specs=[pl.BlockSpec((tr, S), lambda i: (i, 0))],
            out_specs=pl.BlockSpec((tr, 1), lambda i: (i, 0)),
            compiler_params=pltpu.CompilerParams(
                dimension_semantics=("parallel",),
                vmem_limit_bytes=vmem_limit_bytes),
            cost_estimate=cost,
        )(x2)
    else:
        # ---- Path B: huge spatial extent -> also tile S, accumulate. ----
        ts = max(_LANE,
                 _round_down_to(block_bytes // (row_align * itemsize), _LANE))
        num_s = pl.cdiv(S, ts)
        ts = _round_up(pl.cdiv(S, num_s), _LANE)                # balance S tiles
        num_s = pl.cdiv(S, ts)
        tr = _round_down_to(
            min(max(row_align, block_bytes // (ts * itemsize)),
                _MAX_TR, r_cap, r_half_cap),
            row_align)
        num_r = pl.cdiv(R, tr)
        valid_last = S - (num_s - 1) * ts     # in-bounds width of last S tile
        out = pl.pallas_call(
            functools.partial(_gap_acc_kernel, inv_s=inv_s, ts=ts,
                              valid_last=valid_last),
            out_shape=out_shape,
            grid=(num_r, num_s),
            in_specs=[pl.BlockSpec((tr, ts), lambda i, k: (i, k))],
            out_specs=pl.BlockSpec((tr, 1), lambda i, k: (i, 0)),
            scratch_shapes=[pltpu.VMEM((tr, _LANE), jnp.float32)],
            compiler_params=pltpu.CompilerParams(
                dimension_semantics=("parallel", "arbitrary"),
                vmem_limit_bytes=vmem_limit_bytes),
            cost_estimate=cost,
        )(x2)

    return out.reshape(N, C, 1, 1)


if __name__ == "__main__":
    key = jax.random.PRNGKey(0)
    k1, k2, k3, k4, k5 = jax.random.split(key, 5)

    # Main case (spec shape): small NCHW activation, Path A, chunked VPU sums.
    x = jax.random.normal(key, (2, 4, 16, 16), dtype=jnp.float32)
    y = gap(x)
    jax.block_until_ready(y)
    ref = jnp.mean(x, axis=(2, 3), keepdims=True)
    assert y.shape == (2, 4, 1, 1)
    assert jnp.allclose(y, ref, atol=1e-5, rtol=1e-5)

    # Ragged rows (R=6 < 8) and sub-128-lane spatial extent (7x7): tail-only.
    xb = jax.random.normal(k1, (2, 3, 7, 7), dtype=jnp.float32)
    yb = gap(xb)
    jax.block_until_ready(yb)
    assert jnp.allclose(yb, jnp.mean(xb, axis=(2, 3), keepdims=True),
                        atol=1e-5, rtol=1e-5)

    # bf16 input (16-row sublane alignment), f32 accumulation inside.
    xc = jax.random.normal(k2, (2, 8, 16, 16), dtype=jnp.bfloat16)
    yc = gap(xc)
    jax.block_until_ready(yc)
    refc = jnp.mean(xc.astype(jnp.float32), axis=(2, 3), keepdims=True)
    assert jnp.allclose(yc.astype(jnp.float32), refc, atol=1e-2, rtol=1e-2)

    # Many lane chunks (S=2304 -> 18 chunks): exercises the fori_loop path.
    xd = jax.random.normal(k3, (2, 4, 48, 48), dtype=jnp.float32)
    yd = gap(xd)
    jax.block_until_ready(yd)
    assert jnp.allclose(yd, jnp.mean(xd, axis=(2, 3), keepdims=True),
                        atol=1e-5, rtol=1e-5)

    # Path B with a ragged last spatial tile (valid_last=192, rem=64).
    xe = jax.random.normal(k4, (2, 8, 24, 24), dtype=jnp.float32)
    ye = gap(xe, block_bytes=16 * 1024)
    jax.block_until_ready(ye)
    assert jnp.allclose(ye, jnp.mean(xe, axis=(2, 3), keepdims=True),
                        atol=1e-5, rtol=1e-5)

    # Path B where S divides evenly into tiles (uniform accumulation branch).
    xf = jax.random.normal(k5, (2, 8, 32, 32), dtype=jnp.float32)
    yf = gap(xf, block_bytes=16 * 1024)
    jax.block_until_ready(yf)
    assert jnp.allclose(yf, jnp.mean(xf, axis=(2, 3), keepdims=True),
                        atol=1e-5, rtol=1e-5)

    print("KERNEL_OK")
</pallas_src>

<mosaic_0001>
module attributes {stable_mosaic.version = 11 : i64} {
  func.func @_gap_rows_kernel(%arg0: i32, %arg1: memref<8x256xf32, #tpu.memory_space<vmem>>, %arg2: memref<8x1xf32, #tpu.memory_space<vmem>>) attributes {dimension_semantics = [#tpu.dimension_semantics<parallel>], iteration_bounds = array<i64: 1>, scalar_prefetch = 0 : i64, scratch_operands = 0 : i64, tpu.core_type = #tpu.core_type<tc>, window_params = [{transform_indices = @transform_0, window_bounds = array<i64: 8, 256>}, {transform_indices = @transform_1, window_bounds = array<i64: 8, 1>}]} {
    %c0 = arith.constant 0 : index
    %c0_0 = arith.constant 0 : index
    %0 = vector.load %arg1[%c0, %c0_0] : memref<8x256xf32, #tpu.memory_space<vmem>>, vector<8x128xf32>
    %c0_1 = arith.constant 0 : index
    %c128 = arith.constant 128 : index
    %1 = vector.load %arg1[%c0_1, %c128] : memref<8x256xf32, #tpu.memory_space<vmem>>, vector<8x128xf32>
    %2 = arith.addf %0, %1 : vector<8x128xf32>
    %cst = arith.constant dense<0.000000e+00> : vector<8xf32>
    %3 = vector.multi_reduction <add>, %2, %cst [1] : vector<8x128xf32> to vector<8xf32>
    %4 = vector.shape_cast %3 : vector<8xf32> to vector<8x1xf32>
    %cst_2 = arith.constant 3.906250e-03 : f32
    %5 = vector.broadcast %cst_2 : f32 to vector<8x1xf32>
    %6 = arith.mulf %4, %5 : vector<8x1xf32>
    %c0_3 = arith.constant 0 : index
    %c0_4 = arith.constant 0 : index
    %7 = vector.load %arg2[%c0_3, %c0_4] : memref<8x1xf32, #tpu.memory_space<vmem>>, vector<8x1xf32>
    tpu.vector_store %arg2[%c0_3, %c0_4], %6 {strides = array<i32>} : memref<8x1xf32, #tpu.memory_space<vmem>>, vector<8x1xf32>,
    return
  }
  func.func @transform_0(%arg0: i32) -> (i32, i32) {
    %c0_i32 = arith.constant 0 : i32
    %c0_i32_0 = arith.constant 0 : i32
    return %arg0, %c0_i32 : i32, i32
  }
  func.func @transform_1(%arg0: i32) -> (i32, i32) {
    %c0_i32 = arith.constant 0 : i32
    %c0_i32_0 = arith.constant 0 : i32
    return %arg0, %c0_i32 : i32, i32
  }
}

</mosaic_0001>

<bundles_post_ra>
// kernel: tpu_custom_call.1
= control target key start
LH: loop header
LB: loop body
LE: loop exit
PB: predicated region body
PF: predicated region fallthrough
CT: control target
= control target key end

     0   :  { %6 = vsyncpa [#allocation3], 0  ;;  %s56_s6 = smov [#allocation2]   ;;  %s73_s0 = inlined_call_operand.hbm [shape: f32[8,256], index: 0, kind: input, shape index: {}]   ;;  %s74_s1 = inlined_call_operand.vmem [shape: f32[8,1], index: 1, kind: output, shape index: {}]  }
   0x1   :  { %s13_s7 = sshll.u32 %s56_s6, 4  ;;  %s14_s7 = int_to_ptr.vmem [resolvable:$true] %s13_s7 }
   0x2   :  { %s42_s8 = scalar_lea.vmem %s14_s7, 256  ;;  %p47_p1 = scmp.lt.s32.totalorder %s14_s7, %s14_s7 }
   0x3   :  { %p43_p0 = scmp.ne.s32.totalorder %s14_s7, %s42_s8  ;;  %p48_p2 = scmp.lt.s32.totalorder %s42_s8, %s42_s8 }
   0x5   :  { %p49_p3 = por %p48_p2, %p47_p1 }
   0x7   :  { %p50_p4 = pnand %p49_p3, %p43_p0 }
   0x9   :  { %53 = shalt.err (!%p50_p4)
}
   0xa   :  { %16 = dma.hbm_to_vmem [thread:$0]  %s73_s0, 256, %s14_s7, [#allocation3]  }
   0xb   :  { %54 = dma.done.wait [#allocation3], 256  }
   0xc   :  { %55 = vsyncadd [#allocation3], 4294967040  ;;  %v20_v0 = vld [vmem:[#allocation2] sm:$0xff]  ;;  %v21_v1 = vld [vmem:[#allocation2 + $0x8] sm:$0xff]  ;;  %vm26_vm0 = vcmask 7168  }
   0xd   :  { %v22_v2 = vadd.f32 %v21_v1, %v20_v0 }
   0xf   :  { %23 = vadd.xlane.f32.xlu0 %v22_v2 }
  0x98   :  { %v24_v3 = vpop.xlane.xlu0 %23 }
  0x99   :  { %v25_v4 = vmul.f32 0.00390625, %v24_v3 }
  0x9b   :  { %27 = vst.msk [vmem:[%s74_s1] sm:$0xff] %vm26_vm0, %v25_v4 }
  0x9c   :  { %32 = vsyncpa [#allocation3], 1 }

</bundles_post_ra>
